<compile_context>
chip_gen: v7x
topology: tpu7x:2x2x1
jax: 0.10.0
libtpu: 0.0.40
codegen_flags: <defaults>
</compile_context>

<pallas_src>
import functools

import jax
import jax.numpy as jnp
from jax.experimental import pallas as pl
from jax.experimental.pallas import tpu as pltpu

LATENT_SIZE = 32  # scaled-down stand-in for latent_size=128

# Whole array resident in VMEM, no blocking / no grid.
_VMEM = pl.BlockSpec(memory_space=pltpu.MemorySpace.VMEM)


# ----------------------------------------------------------------------------
# Pallas kernels
# ----------------------------------------------------------------------------
def _matmul_bias_act_kernel(a_ref, b_ref, bias_ref, o_ref, *, activation):
    """o = act(a @ b + bias); all operands VMEM-resident, single MXU pass."""
    r = jnp.dot(a_ref[...], b_ref[...], preferred_element_type=jnp.float32)
    r = r + bias_ref[...]
    if activation == "relu":
        r = jnp.maximum(r, 0.0)
    elif activation == "sigmoid":
        r = jax.nn.sigmoid(r)
    o_ref[...] = r.astype(o_ref.dtype)


def matmul_bias_act(a, b, bias2d, activation=None):
    """act(a @ b + bias). a: (M, K), b: (K, N), bias2d: (1, N).

    No padding: block shapes equal the full array extents, grid-less single
    invocation (operands here are at most a few hundred KiB)."""
    M, K = a.shape
    K2, N = b.shape
    assert K == K2 and bias2d.shape == (1, N)
    kernel = functools.partial(_matmul_bias_act_kernel, activation=activation)
    return pl.pallas_call(
        kernel,
        out_shape=jax.ShapeDtypeStruct((M, N), jnp.float32),
        in_specs=[_VMEM, _VMEM, _VMEM],
        out_specs=_VMEM,
    )(a.astype(jnp.float32), b, bias2d)


def _dense_chunk_kernel(h_ref, wenc_ref, benc_ref, whead_ref, bhead_ref,
                        wdec_ref, bdec_ref, heads_ref, dech_ref):
    """enc_fc -> fused (mu|logvar) heads -> eval reparameterize (z = mu)
    -> dec_fc + relu, all inside one VMEM-resident kernel."""
    enc_z = jnp.dot(h_ref[...], wenc_ref[...],
                    preferred_element_type=jnp.float32) + benc_ref[...]
    heads = jnp.dot(enc_z, whead_ref[...],
                    preferred_element_type=jnp.float32) + bhead_ref[...]
    heads_ref[...] = heads
    # dec_fc consumes only the mu half of `heads`: wdec is zero-padded over the
    # logvar rows, so no in-kernel value slice is needed.
    dec_h = jnp.dot(heads, wdec_ref[...],
                    preferred_element_type=jnp.float32) + bdec_ref[...]
    dech_ref[...] = jnp.maximum(dec_h, 0.0)


def dense_chunk(h, wenc, benc, whead, bhead, wdec, bdec):
    B = h.shape[0]
    return pl.pallas_call(
        _dense_chunk_kernel,
        out_shape=(
            jax.ShapeDtypeStruct((B, whead.shape[1]), jnp.float32),  # mu|logvar
            jax.ShapeDtypeStruct((B, wdec.shape[1]), jnp.float32),   # dec_fc out
        ),
        in_specs=[_VMEM] * 7,
        out_specs=(_VMEM, _VMEM),
    )(h.astype(jnp.float32), wenc, benc, whead, bhead, wdec, bdec)


# ----------------------------------------------------------------------------
# JAX-side glue: NHWC im2col (no transposes) and depth-to-space
# ----------------------------------------------------------------------------
def im2col_nhwc(x, kh, kw, stride, padding):
    """x: (B, H, W, C) -> (B*Ho*Wo, kh*kw*C), tap-major / channel-minor."""
    B, H, W, C = x.shape
    xp = jnp.pad(x, ((0, 0), (padding, padding), (padding, padding), (0, 0)))
    Ho = (H + 2 * padding - kh) // stride + 1
    Wo = (W + 2 * padding - kw) // stride + 1
    cols = [xp[:, i:i + stride * Ho:stride, j:j + stride * Wo:stride, :]
            for i in range(kh) for j in range(kw)]
    col = jnp.stack(cols, axis=3)                       # (B, Ho, Wo, kh*kw, C)
    return col.reshape(B * Ho * Wo, kh * kw * C), Ho, Wo


def depth_to_space2(y, B, H, W, cout):
    """y: (B*H*W, 4*cout), columns ordered (phase_r, phase_c, cout)
    -> NHWC (B, 2H, 2W, cout)."""
    y = y.reshape(B, H, W, 2, 2, cout).transpose(0, 1, 3, 2, 4, 5)
    return y.reshape(B, 2 * H, 2 * W, cout)


# ----------------------------------------------------------------------------
# One-time weight repacking (PyTorch layouts -> matmul-ready layouts)
# ----------------------------------------------------------------------------
def _conv_w_to_mat(w):
    """Conv2d weight (Cout, Cin, kh, kw) -> (kh*kw*Cin, Cout) matching im2col_nhwc."""
    cout, cin, kh, kw = w.shape
    return jnp.transpose(w, (2, 3, 1, 0)).reshape(kh * kw * cin, cout).astype(jnp.float32)


def _deconv_w_to_subpixel(w):
    """ConvTranspose2d weight (Cin, Cout, 4, 4), stride=2, padding=1 ->
    sub-pixel matrix (9*Cin, 4*Cout): a 3x3 / stride-1 im2col matmul whose
    output columns are the 4 stride phases; depth_to_space2 yields the deconv
    output exactly (equivalent to the zero-dilated-input formulation)."""
    cin, cout, kh, kw = w.shape
    assert kh == 4 and kw == 4
    w_sub = jnp.zeros((9 * cin, 4 * cout), jnp.float32)
    for r in range(2):
        for c in range(2):
            for u in range(r, r + 2):         # window row offset in padded input
                for v in range(c, c + 2):     # window col offset
                    khi, kwi = 3 + r - 2 * u, 3 + c - 2 * v
                    w_sub = w_sub.at[(u * 3 + v) * cin:(u * 3 + v + 1) * cin,
                                     (r * 2 + c) * cout:(r * 2 + c + 1) * cout
                                     ].set(w[:, :, khi, kwi])
    return w_sub


def prepare_params(p, latent_size=LATENT_SIZE):
    def b2d(b):
        return b.reshape(1, -1).astype(jnp.float32)

    return {
        "conv1_w": _conv_w_to_mat(p["enc_conv1_w"]), "conv1_b": b2d(p["enc_conv1_b"]),
        "conv2_w": _conv_w_to_mat(p["enc_conv2_w"]), "conv2_b": b2d(p["enc_conv2_b"]),
        "enc_fc_w": p["enc_fc_w"].T.astype(jnp.float32), "enc_fc_b": b2d(p["enc_fc_b"]),
        # fused mu/logvar heads: one (latent, 2*latent) matmul
        "head_w": jnp.concatenate([p["fc1_w"].T, p["fc2_w"].T], axis=1).astype(jnp.float32),
        "head_b": jnp.concatenate([p["fc1_b"], p["fc2_b"]]).reshape(1, -1).astype(jnp.float32),
        # dec_fc applied to `heads` directly; logvar rows zeroed (eval: z = mu)
        "dec_fc_w": jnp.concatenate(
            [p["dec_fc_w"].T, jnp.zeros((latent_size, p["dec_fc_w"].shape[0]))],
            axis=0).astype(jnp.float32),
        "dec_fc_b": b2d(p["dec_fc_b"]),
        "deconv1_w": _deconv_w_to_subpixel(p["dec_deconv1_w"]),
        "deconv1_b": b2d(jnp.tile(p["dec_deconv1_b"], 4)),
        "deconv2_w": _deconv_w_to_subpixel(p["dec_deconv2_w"]),
        "deconv2_b": b2d(jnp.tile(p["dec_deconv2_b"], 4)),
    }


# ----------------------------------------------------------------------------
# Deterministic parameter init (PyTorch layouts, shapes from the module)
# ----------------------------------------------------------------------------
def init_params(key, latent_size=LATENT_SIZE):
    keys = jax.random.split(key, 8)

    def n(k, shape, std=0.05):
        return std * jax.random.normal(k, shape, jnp.float32)

    return {
        # encoder: Conv2d(3->8,4,2,1), Conv2d(8->16,4,2,1), Linear(16*4*4 -> latent)
        "enc_conv1_w": n(keys[0], (8, 3, 4, 4)),
        "enc_conv1_b": jnp.zeros((8,), jnp.float32),
        "enc_conv2_w": n(keys[1], (16, 8, 4, 4)),
        "enc_conv2_b": jnp.zeros((16,), jnp.float32),
        "enc_fc_w": n(keys[2], (latent_size, 16 * 4 * 4)),
        "enc_fc_b": jnp.zeros((latent_size,), jnp.float32),
        # VAE heads: fc1 (mu), fc2 (logvar), each Linear(latent, latent)
        "fc1_w": n(keys[3], (latent_size, latent_size)),
        "fc1_b": jnp.zeros((latent_size,), jnp.float32),
        "fc2_w": n(keys[4], (latent_size, latent_size)),
        "fc2_b": jnp.zeros((latent_size,), jnp.float32),
        # decoder: Linear(latent -> 16*4*4), ConvT(16->8,4,2,1), ConvT(8->3,4,2,1)
        "dec_fc_w": n(keys[5], (16 * 4 * 4, latent_size)),
        "dec_fc_b": jnp.zeros((16 * 4 * 4,), jnp.float32),
        "dec_deconv1_w": n(keys[6], (16, 8, 4, 4)),
        "dec_deconv1_b": jnp.zeros((8,), jnp.float32),
        "dec_deconv2_w": n(keys[7], (8, 3, 4, 4)),
        "dec_deconv2_b": jnp.zeros((3,), jnp.float32),
    }


# ----------------------------------------------------------------------------
# VAE.forward (eval mode): returns (reconstruction, mu, logvar)
# ----------------------------------------------------------------------------
def vae_forward(x_nchw, pp, latent_size=LATENT_SIZE):
    B = x_nchw.shape[0]
    x = jnp.transpose(x_nchw, (0, 2, 3, 1))                      # NHWC internally

    # --- encoder: Conv(3->8,4,2,1)+relu, Conv(8->16,4,2,1)+relu, flatten ---
    col, ho, wo = im2col_nhwc(x, 4, 4, stride=2, padding=1)
    h = matmul_bias_act(col, pp["conv1_w"], pp["conv1_b"], "relu")
    h = h.reshape(B, ho, wo, 8)                                   # (B, 8, 8, 8)

    col, ho, wo = im2col_nhwc(h, 4, 4, stride=2, padding=1)
    h = matmul_bias_act(col, pp["conv2_w"], pp["conv2_b"], "relu")
    h = h.reshape(B, ho * wo * 16)                                # (B, 256)

    # --- enc_fc + fused (mu|logvar) heads + eval reparameterize + dec_fc ---
    heads, dec_h = dense_chunk(h, pp["enc_fc_w"], pp["enc_fc_b"],
                               pp["head_w"], pp["head_b"],
                               pp["dec_fc_w"], pp["dec_fc_b"])
    mu = heads[:, :latent_size]
    logvar = heads[:, latent_size:]

    # --- decoder: reshape, ConvT(16->8,4,2,1)+relu, ConvT(8->3,4,2,1)+sigmoid ---
    hd = dec_h.reshape(B, 4, 4, 16)
    col, ho, wo = im2col_nhwc(hd, 3, 3, stride=1, padding=1)
    y = matmul_bias_act(col, pp["deconv1_w"], pp["deconv1_b"], "relu")
    hd = depth_to_space2(y, B, ho, wo, 8)                         # (B, 8, 8, 8)

    col, ho, wo = im2col_nhwc(hd, 3, 3, stride=1, padding=1)
    y = matmul_bias_act(col, pp["deconv2_w"], pp["deconv2_b"], "sigmoid")
    recon = depth_to_space2(y, B, ho, wo, 3)                      # (B, 16, 16, 3)
    recon = jnp.transpose(recon, (0, 3, 1, 2))                    # back to NCHW

    # PyTorch does mu.squeeze()/logvar.squeeze(); with B==1 that drops the batch
    # dim there too, so jnp.squeeze matches the module's semantics exactly.
    return recon, jnp.squeeze(mu), jnp.squeeze(logvar)


if __name__ == "__main__":
    key = jax.random.PRNGKey(0)
    k_x, k_p = jax.random.split(key)
    x = jax.random.normal(k_x, (2, 3, 16, 16), jnp.float32)  # NCHW, like PyTorch
    params = init_params(k_p)
    prepared = prepare_params(params)   # one-time weight repack, outside jit

    fwd = jax.jit(vae_forward)
    recon, mu, logvar = fwd(x, prepared)
    jax.block_until_ready((recon, mu, logvar))

    assert recon.shape == (2, 3, 16, 16)
    assert mu.shape == (2, LATENT_SIZE)
    assert logvar.shape == (2, LATENT_SIZE)
    assert bool(jnp.all(jnp.isfinite(recon)))
    assert bool(jnp.all((recon >= 0.0) & (recon <= 1.0)))  # sigmoid output
    print("KERNEL_OK")
</pallas_src>

<mosaic_0001>
module attributes {stable_mosaic.version = 11 : i64} {
  func.func @_matmul_bias_act_kernel(%arg0: memref<128x48xf32, #tpu.memory_space<vmem>>, %arg1: memref<48x8xf32, #tpu.memory_space<vmem>>, %arg2: memref<1x8xf32, #tpu.memory_space<vmem>>, %arg3: memref<128x8xf32, #tpu.memory_space<vmem>>) attributes {dimension_semantics = [], scalar_prefetch = 0 : i64, scratch_operands = 0 : i64, tpu.core_type = #tpu.core_type<tc>} {
    %c0 = arith.constant 0 : index
    %c0_0 = arith.constant 0 : index
    %0 = vector.load %arg0[%c0, %c0_0] : memref<128x48xf32, #tpu.memory_space<vmem>>, vector<128x48xf32>
    %c0_1 = arith.constant 0 : index
    %c0_2 = arith.constant 0 : index
    %1 = vector.load %arg1[%c0_1, %c0_2] : memref<48x8xf32, #tpu.memory_space<vmem>>, vector<48x8xf32>
    %cst = arith.constant dense<0.000000e+00> : vector<128x8xf32>
    %2 = tpu.matmul %0, %1, %cst {dimension_numbers = #tpu.dot_dimension_numbers<[1], [0], [0], [1], [0, 0, 1, 1], [], []>} : vector<128x48xf32>, vector<48x8xf32>, vector<128x8xf32> -> vector<128x8xf32>
    %c0_3 = arith.constant 0 : index
    %c0_4 = arith.constant 0 : index
    %3 = vector.load %arg2[%c0_3, %c0_4] : memref<1x8xf32, #tpu.memory_space<vmem>>, vector<1x8xf32>
    %4 = vector.broadcast %3 : vector<1x8xf32> to vector<128x8xf32>
    %5 = arith.addf %2, %4 : vector<128x8xf32>
    %cst_5 = arith.constant 0.000000e+00 : f32
    %6 = vector.broadcast %cst_5 : f32 to vector<128x8xf32>
    %7 = arith.maximumf %5, %6 : vector<128x8xf32>
    %c0_6 = arith.constant 0 : index
    %c0_7 = arith.constant 0 : index
    %8 = vector.load %arg3[%c0_6, %c0_7] : memref<128x8xf32, #tpu.memory_space<vmem>>, vector<128x8xf32>
    tpu.vector_store %arg3[%c0_6, %c0_7], %7 {strides = array<i32>} : memref<128x8xf32, #tpu.memory_space<vmem>>, vector<128x8xf32>,
    return
  }
}

module attributes {stable_mosaic.version = 11 : i64} {
  func.func @_matmul_bias_act_kernel(%arg0: memref<32x128xf32, #tpu.memory_space<vmem>>, %arg1: memref<128x16xf32, #tpu.memory_space<vmem>>, %arg2: memref<1x16xf32, #tpu.memory_space<vmem>>, %arg3: memref<32x16xf32, #tpu.memory_space<vmem>>) attributes {dimension_semantics = [], scalar_prefetch = 0 : i64, scratch_operands = 0 : i64, tpu.core_type = #tpu.core_type<tc>} {
    %c0 = arith.constant 0 : index
    %c0_0 = arith.constant 0 : index
    %0 = vector.load %arg0[%c0, %c0_0] : memref<32x128xf32, #tpu.memory_space<vmem>>, vector<32x128xf32>
    %c0_1 = arith.constant 0 : index
    %c0_2 = arith.constant 0 : index
    %1 = vector.load %arg1[%c0_1, %c0_2] : memref<128x16xf32, #tpu.memory_space<vmem>>, vector<128x16xf32>
    %cst = arith.constant dense<0.000000e+00> : vector<32x16xf32>
    %2 = tpu.matmul %0, %1, %cst {dimension_numbers = #tpu.dot_dimension_numbers<[1], [0], [0], [1], [0, 0, 1, 1], [], []>} : vector<32x128xf32>, vector<128x16xf32>, vector<32x16xf32> -> vector<32x16xf32>
    %c0_3 = arith.constant 0 : index
    %c0_4 = arith.constant 0 : index
    %3 = vector.load %arg2[%c0_3, %c0_4] : memref<1x16xf32, #tpu.memory_space<vmem>>, vector<1x16xf32>
    %4 = vector.broadcast %3 : vector<1x16xf32> to vector<32x16xf32>
    %5 = arith.addf %2, %4 : vector<32x16xf32>
    %cst_5 = arith.constant 0.000000e+00 : f32
    %6 = vector.broadcast %cst_5 : f32 to vector<32x16xf32>
    %7 = arith.maximumf %5, %6 : vector<32x16xf32>
    %c0_6 = arith.constant 0 : index
    %c0_7 = arith.constant 0 : index
    %8 = vector.load %arg3[%c0_6, %c0_7] : memref<32x16xf32, #tpu.memory_space<vmem>>, vector<32x16xf32>
    tpu.vector_store %arg3[%c0_6, %c0_7], %7 {strides = array<i32>} : memref<32x16xf32, #tpu.memory_space<vmem>>, vector<32x16xf32>,
    return
  }
}

module attributes {stable_mosaic.version = 11 : i64} {
  func.func @_dense_chunk_kernel(%arg0: memref<2x256xf32, #tpu.memory_space<vmem>>, %arg1: memref<256x32xf32, #tpu.memory_space<vmem>>, %arg2: memref<1x32xf32, #tpu.memory_space<vmem>>, %arg3: memref<32x64xf32, #tpu.memory_space<vmem>>, %arg4: memref<1x64xf32, #tpu.memory_space<vmem>>, %arg5: memref<64x256xf32, #tpu.memory_space<vmem>>, %arg6: memref<1x256xf32, #tpu.memory_space<vmem>>, %arg7: memref<2x64xf32, #tpu.memory_space<vmem>>, %arg8: memref<2x256xf32, #tpu.memory_space<vmem>>) attributes {dimension_semantics = [], scalar_prefetch = 0 : i64, scratch_operands = 0 : i64, tpu.core_type = #tpu.core_type<tc>} {
    %c0 = arith.constant 0 : index
    %c0_0 = arith.constant 0 : index
    %0 = vector.load %arg0[%c0, %c0_0] : memref<2x256xf32, #tpu.memory_space<vmem>>, vector<2x256xf32>
    %c0_1 = arith.constant 0 : index
    %c0_2 = arith.constant 0 : index
    %1 = vector.load %arg1[%c0_1, %c0_2] : memref<256x32xf32, #tpu.memory_space<vmem>>, vector<256x32xf32>
    %cst = arith.constant dense<0.000000e+00> : vector<2x32xf32>
    %2 = tpu.matmul %0, %1, %cst {dimension_numbers = #tpu.dot_dimension_numbers<[1], [0], [0], [1], [0, 0, 1, 1], [], []>} : vector<2x256xf32>, vector<256x32xf32>, vector<2x32xf32> -> vector<2x32xf32>
    %c0_3 = arith.constant 0 : index
    %c0_4 = arith.constant 0 : index
    %3 = vector.load %arg2[%c0_3, %c0_4] : memref<1x32xf32, #tpu.memory_space<vmem>>, vector<1x32xf32>
    %4 = vector.broadcast %3 : vector<1x32xf32> to vector<2x32xf32>
    %5 = arith.addf %2, %4 : vector<2x32xf32>
    %c0_5 = arith.constant 0 : index
    %c0_6 = arith.constant 0 : index
    %6 = vector.load %arg3[%c0_5, %c0_6] : memref<32x64xf32, #tpu.memory_space<vmem>>, vector<32x64xf32>
    %cst_7 = arith.constant dense<0.000000e+00> : vector<2x64xf32>
    %7 = tpu.matmul %5, %6, %cst_7 {dimension_numbers = #tpu.dot_dimension_numbers<[1], [0], [0], [1], [0, 0, 1, 1], [], []>} : vector<2x32xf32>, vector<32x64xf32>, vector<2x64xf32> -> vector<2x64xf32>
    %c0_8 = arith.constant 0 : index
    %c0_9 = arith.constant 0 : index
    %8 = vector.load %arg4[%c0_8, %c0_9] : memref<1x64xf32, #tpu.memory_space<vmem>>, vector<1x64xf32>
    %9 = vector.broadcast %8 : vector<1x64xf32> to vector<2x64xf32>
    %10 = arith.addf %7, %9 : vector<2x64xf32>
    %c0_10 = arith.constant 0 : index
    %c0_11 = arith.constant 0 : index
    %11 = vector.load %arg7[%c0_10, %c0_11] : memref<2x64xf32, #tpu.memory_space<vmem>>, vector<2x64xf32>
    tpu.vector_store %arg7[%c0_10, %c0_11], %10 {strides = array<i32>} : memref<2x64xf32, #tpu.memory_space<vmem>>, vector<2x64xf32>,
    %c0_12 = arith.constant 0 : index
    %c0_13 = arith.constant 0 : index
    %12 = vector.load %arg5[%c0_12, %c0_13] : memref<64x256xf32, #tpu.memory_space<vmem>>, vector<64x256xf32>
    %cst_14 = arith.constant dense<0.000000e+00> : vector<2x256xf32>
    %13 = tpu.matmul %10, %12, %cst_14 {dimension_numbers = #tpu.dot_dimension_numbers<[1], [0], [0], [1], [0, 0, 1, 1], [], []>} : vector<2x64xf32>, vector<64x256xf32>, vector<2x256xf32> -> vector<2x256xf32>
    %c0_15 = arith.constant 0 : index
    %c0_16 = arith.constant 0 : index
    %14 = vector.load %arg6[%c0_15, %c0_16] : memref<1x256xf32, #tpu.memory_space<vmem>>, vector<1x256xf32>
    %15 = vector.broadcast %14 : vector<1x256xf32> to vector<2x256xf32>
    %16 = arith.addf %13, %15 : vector<2x256xf32>
    %cst_17 = arith.constant 0.000000e+00 : f32
    %17 = vector.broadcast %cst_17 : f32 to vector<2x256xf32>
    %18 = arith.maximumf %16, %17 : vector<2x256xf32>
    %c0_18 = arith.constant 0 : index
    %c0_19 = arith.constant 0 : index
    %19 = vector.load %arg8[%c0_18, %c0_19] : memref<2x256xf32, #tpu.memory_space<vmem>>, vector<2x256xf32>
    tpu.vector_store %arg8[%c0_18, %c0_19], %18 {strides = array<i32>} : memref<2x256xf32, #tpu.memory_space<vmem>>, vector<2x256xf32>,
    return
  }
}

module attributes {stable_mosaic.version = 11 : i64} {
  func.func @_matmul_bias_act_kernel(%arg0: memref<32x144xf32, #tpu.memory_space<vmem>>, %arg1: memref<144x32xf32, #tpu.memory_space<vmem>>, %arg2: memref<1x32xf32, #tpu.memory_space<vmem>>, %arg3: memref<32x32xf32, #tpu.memory_space<vmem>>) attributes {dimension_semantics = [], scalar_prefetch = 0 : i64, scratch_operands = 0 : i64, tpu.core_type = #tpu.core_type<tc>} {
    %c0 = arith.constant 0 : index
    %c0_0 = arith.constant 0 : index
    %0 = vector.load %arg0[%c0, %c0_0] : memref<32x144xf32, #tpu.memory_space<vmem>>, vector<32x144xf32>
    %c0_1 = arith.constant 0 : index
    %c0_2 = arith.constant 0 : index
    %1 = vector.load %arg1[%c0_1, %c0_2] : memref<144x32xf32, #tpu.memory_space<vmem>>, vector<144x32xf32>
    %cst = arith.constant dense<0.000000e+00> : vector<32x32xf32>
    %2 = tpu.matmul %0, %1, %cst {dimension_numbers = #tpu.dot_dimension_numbers<[1], [0], [0], [1], [0, 0, 1, 1], [], []>} : vector<32x144xf32>, vector<144x32xf32>, vector<32x32xf32> -> vector<32x32xf32>
    %c0_3 = arith.constant 0 : index
    %c0_4 = arith.constant 0 : index
    %3 = vector.load %arg2[%c0_3, %c0_4] : memref<1x32xf32, #tpu.memory_space<vmem>>, vector<1x32xf32>
    %4 = vector.broadcast %3 : vector<1x32xf32> to vector<32x32xf32>
    %5 = arith.addf %2, %4 : vector<32x32xf32>
    %cst_5 = arith.constant 0.000000e+00 : f32
    %6 = vector.broadcast %cst_5 : f32 to vector<32x32xf32>
    %7 = arith.maximumf %5, %6 : vector<32x32xf32>
    %c0_6 = arith.constant 0 : index
    %c0_7 = arith.constant 0 : index
    %8 = vector.load %arg3[%c0_6, %c0_7] : memref<32x32xf32, #tpu.memory_space<vmem>>, vector<32x32xf32>
    tpu.vector_store %arg3[%c0_6, %c0_7], %7 {strides = array<i32>} : memref<32x32xf32, #tpu.memory_space<vmem>>, vector<32x32xf32>,
    return
  }
}

module attributes {stable_mosaic.version = 11 : i64} {
  func.func @_matmul_bias_act_kernel(%arg0: memref<128x72xf32, #tpu.memory_space<vmem>>, %arg1: memref<72x12xf32, #tpu.memory_space<vmem>>, %arg2: memref<1x12xf32, #tpu.memory_space<vmem>>, %arg3: memref<128x12xf32, #tpu.memory_space<vmem>>) attributes {dimension_semantics = [], scalar_prefetch = 0 : i64, scratch_operands = 0 : i64, tpu.core_type = #tpu.core_type<tc>} {
    %c0 = arith.constant 0 : index
    %c0_0 = arith.constant 0 : index
    %0 = vector.load %arg0[%c0, %c0_0] : memref<128x72xf32, #tpu.memory_space<vmem>>, vector<128x72xf32>
    %c0_1 = arith.constant 0 : index
    %c0_2 = arith.constant 0 : index
    %1 = vector.load %arg1[%c0_1, %c0_2] : memref<72x12xf32, #tpu.memory_space<vmem>>, vector<72x12xf32>
    %cst = arith.constant dense<0.000000e+00> : vector<128x12xf32>
    %2 = tpu.matmul %0, %1, %cst {dimension_numbers = #tpu.dot_dimension_numbers<[1], [0], [0], [1], [0, 0, 1, 1], [], []>} : vector<128x72xf32>, vector<72x12xf32>, vector<128x12xf32> -> vector<128x12xf32>
    %c0_3 = arith.constant 0 : index
    %c0_4 = arith.constant 0 : index
    %3 = vector.load %arg2[%c0_3, %c0_4] : memref<1x12xf32, #tpu.memory_space<vmem>>, vector<1x12xf32>
    %4 = vector.broadcast %3 : vector<1x12xf32> to vector<128x12xf32>
    %5 = arith.addf %2, %4 : vector<128x12xf32>
    %6 = arith.negf %5 : vector<128x12xf32>
    %7 = math.exp %6 : vector<128x12xf32>
    %cst_5 = arith.constant 1.000000e+00 : f32
    %8 = vector.broadcast %cst_5 : f32 to vector<128x12xf32>
    %9 = arith.addf %8, %7 : vector<128x12xf32>
    %10 = arith.divf %8, %9 : vector<128x12xf32>
    %c0_6 = arith.constant 0 : index
    %c0_7 = arith.constant 0 : index
    %11 = vector.load %arg3[%c0_6, %c0_7] : memref<128x12xf32, #tpu.memory_space<vmem>>, vector<128x12xf32>
    tpu.vector_store %arg3[%c0_6, %c0_7], %10 {strides = array<i32>} : memref<128x12xf32, #tpu.memory_space<vmem>>, vector<128x12xf32>,
    return
  }
}

</mosaic_0001>

<bundles_post_ra>
// kernel: vae_forward.5
= control target key start
LH: loop header
LB: loop body
LE: loop exit
PB: predicated region body
PF: predicated region fallthrough
CT: control target
= control target key end

     0   :  { %vm43_vm0 = vcmask 392192   ;;  %vm253_vm1 = vcmask 64512   ;;  %s536_s1 = inlined_call_operand.vmem [shape: f32[48,8], index: 1, kind: input, shape index: {}]   ;;  %s537_s0 = inlined_call_operand.vmem [shape: f32[128,48], index: 0, kind: input, shape index: {}]   ;;  %s538_s2 = inlined_call_operand.vmem [shape: f32[1,8], index: 2, kind: input, shape index: {}]   ;;  %s539_s3 = inlined_call_operand.vmem [shape: f32[128,8], index: 3, kind: output, shape index: {}]  }
   0x1   :  { %v30_v0 = vld [vmem:[%s536_s1] sm:$0xff]  ;;  %v31_v1 = vld [vmem:[%s536_s1 + $0x8] sm:$0xff]  ;;  %v32_v2 = vld [vmem:[%s536_s1 + $0x10] sm:$0xff] }
   0x2   :  { %v349_v3 = vpack.c.bf16 %v31_v1, %v30_v0  ;;  %v33_v4 = vld [vmem:[%s536_s1 + $0x18] sm:$0xff]  ;;  %v34_v6 = vld [vmem:[%s536_s1 + $0x20] sm:$0xff]  ;;  %v35_v7 = vld [vmem:[%s536_s1 + $0x28] sm:$0xff] }
   0x3   :  { %v353_v5 = vpack.c.bf16 %v33_v4, %v32_v2  ;;  %v14_v8 = vld [vmem:[%s537_s0] sm:$0xff]  ;;  %v357_v10 = vpack.c.bf16 %v35_v7, %v34_v6  ;;  %v15_v11 = vld [vmem:[%s537_s0 + $0x8] sm:$0xff]  ;;  %v16_v13 = vld [vmem:[%s537_s0 + $0x10] sm:$0xff] }
   0x4   :  { %350 = vmatprep.subr.bf16.mxu0 %v349_v3  ;;  %361 = vmatprep.subr.bf16.mxu1 %v349_v3  ;;  %v22_v9 = vld [vmem:[%s537_s0 + $0x40] sm:$0xff]  ;;  %v23_v12 = vld [vmem:[%s537_s0 + $0x48] sm:$0xff]  ;;  %v24_v14 = vld [vmem:[%s537_s0 + $0x50] sm:$0xff] }
   0x5   :  { %352 = vmatpush3.bf16.msra.mxu0 %v349_v3  ;;  %364 = vmatpush3.bf16.msra.mxu1 %v349_v3  ;;  %v17_v15 = vld [vmem:[%s537_s0 + $0x18] sm:$0xff]  ;;  %v18_v17 = vld [vmem:[%s537_s0 + $0x20] sm:$0xff]  ;;  %v19_v19 = vld [vmem:[%s537_s0 + $0x28] sm:$0xff] }
   0x6   :  { %354 = vmatprep.subr.bf16.mxu0 %v353_v5  ;;  %362 = vmatprep.subr.bf16.mxu1 %v353_v5  ;;  %v25_v16 = vld [vmem:[%s537_s0 + $0x58] sm:$0xff]  ;;  %v26_v18 = vld [vmem:[%s537_s0 + $0x60] sm:$0xff]  ;;  %v27_v20 = vld [vmem:[%s537_s0 + $0x68] sm:$0xff] }
   0x7   :  { %325 = vmatprep.mubr.msk.f32.mxu0 %vm43_vm0, %v14_v8  ;;  %337 = vmatprep.mubr.msk.f32.mxu1 %vm43_vm0, %v22_v9  ;;  %v20_v21 = vld [vmem:[%s537_s0 + $0x30] sm:$0xff]  ;;  %v21_v23 = vld [vmem:[%s537_s0 + $0x38] sm:$0xff]  ;;  %v274_v25 = vld [vmem:[%s538_s2] ss:$0 sm:$0xff] }
   0x8   :  { %v28_v22 = vld [vmem:[%s537_s0 + $0x70] sm:$0xff]  ;;  %v29_v24 = vld [vmem:[%s537_s0 + $0x78] sm:$0xff] }
   0x9   :  { %356 = vmatpush3.bf16.msra.mxu0 %v353_v5  ;;  %365 = vmatpush3.bf16.msra.mxu1 %v353_v5 }
   0xa   :  { %358 = vmatprep.subr.bf16.mxu0 %v357_v10  ;;  %363 = vmatprep.subr.bf16.mxu1 %v357_v10 }
   0xd   :  { %360 = vmatpush3.bf16.msra.mxu0 %v357_v10  ;;  %366 = vmatpush3.bf16.msra.mxu1 %v357_v10 }
  0x10   :  { %326 = vmatmul.mubr.msk.f32.vlgmr.msra.gmra.mrb[0].mxu0 %vm43_vm0, %v15_v11  ;;  %338 = vmatmul.mubr.msk.f32.vlgmr.msra.gmra.mrb[0].mxu1 %vm43_vm0, %v23_v12 }
  0x11   :  { %328 = vmatprep.mubr.msk.f32.mxu0 %vm43_vm0, %v16_v13  ;;  %340 = vmatprep.mubr.msk.f32.mxu1 %vm43_vm0, %v24_v14 }
  0x14   :  { %329 = vmatmul.mubr.msk.f32.gmra.mrb[2].mxu0 %vm43_vm0, %v17_v15  ;;  %341 = vmatmul.mubr.msk.f32.gmra.mrb[2].mxu1 %vm43_vm0, %v25_v16 }
  0x15   :  { %331 = vmatprep.mubr.msk.f32.mxu0 %vm43_vm0, %v18_v17  ;;  %343 = vmatprep.mubr.msk.f32.mxu1 %vm43_vm0, %v26_v18 }
  0x18   :  { %332 = vmatmul.mubr.msk.f32.gmra.mrb[4].mxu0 %vm43_vm0, %v19_v19  ;;  %344 = vmatmul.mubr.msk.f32.gmra.mrb[4].mxu1 %vm43_vm0, %v27_v20 }
  0x19   :  { %334 = vmatprep.mubr.msk.f32.mxu0 %vm43_vm0, %v20_v21  ;;  %346 = vmatprep.mubr.msk.f32.mxu1 %vm43_vm0, %v28_v22 }
  0x1c   :  { %335 = vmatmul.mubr.msk.f32.gmra.mrb[6].mxu0 %vm43_vm0, %v21_v23  ;;  %347 = vmatmul.mubr.msk.f32.gmra.mrb[6].mxu1 %vm43_vm0, %v29_v24 }
  0xe3   :  { %v327_v26 = vpop.f32.mrb[0].mxu0  ;;  %v339_v27 = vpop.f32.mrb[0].mxu1 }
  0xe4   :  { %v164_v28 = vadd.f32 %v327_v26, %v274_v25  ;;  %v204_v29 = vadd.f32 %v339_v27, %v274_v25  ;;  %v158_v30 = vpop.f32.mrb[1].mxu0  ;;  %v198_v31 = vpop.f32.mrb[1].mxu1 }
  0xe5   :  { %v159_v32 = vadd.f32 %v274_v25, %v158_v30  ;;  %v199_v33 = vadd.f32 %v274_v25, %v198_v31 }
  0xe6   :  { %v238_v34 = vmax.f32 %v164_v28, 0.0  ;;  %v246_v35 = vmax.f32 %v204_v29, 0.0 }
  0xe7   :  { %v237_v36 = vmax.f32 %v159_v32, 0.0  ;;  %v245_v37 = vmax.f32 %v199_v33, 0.0  ;;  %v330_v38 = vpop.f32.mrb[2].mxu0  ;;  %v342_v39 = vpop.f32.mrb[2].mxu1 }
  0xe8   :  { %255 = vst.msk [vmem:[%s539_s3 + $0x8] sm:$0xff] %vm253_vm1, %v238_v34  ;;  %263 = vst.msk [vmem:[%s539_s3 + $0x48] sm:$0xff] %vm253_vm1, %v246_v35  ;;  %v174_v40 = vadd.f32 %v330_v38, %v274_v25  ;;  %v214_v41 = vadd.f32 %v342_v39, %v274_v25  ;;  %v168_v42 = vpop.f32.mrb[3].mxu0  ;;  %v208_v43 = vpop.f32.mrb[3].mxu1 }
  0xe9   :  { %254 = vst.msk [vmem:[%s539_s3] sm:$0xff] %vm253_vm1, %v237_v36  ;;  %262 = vst.msk [vmem:[%s539_s3 + $0x40] sm:$0xff] %vm253_vm1, %v245_v37  ;;  %v169_v44 = vadd.f32 %v274_v25, %v168_v42  ;;  %v209_v45 = vadd.f32 %v274_v25, %v208_v43 }
  0xea   :  { %v240_v46 = vmax.f32 %v174_v40, 0.0  ;;  %v248_v47 = vmax.f32 %v214_v41, 0.0 }
  0xeb   :  { %v239_v48 = vmax.f32 %v169_v44, 0.0  ;;  %v247_v49 = vmax.f32 %v209_v45, 0.0  ;;  %v333_v50 = vpop.f32.mrb[4].mxu0  ;;  %v345_v51 = vpop.f32.mrb[4].mxu1 }
  0xec   :  { %257 = vst.msk [vmem:[%s539_s3 + $0x18] sm:$0xff] %vm253_vm1, %v240_v46  ;;  %265 = vst.msk [vmem:[%s539_s3 + $0x58] sm:$0xff] %vm253_vm1, %v248_v47  ;;  %v184_v52 = vadd.f32 %v333_v50, %v274_v25  ;;  %v224_v53 = vadd.f32 %v345_v51, %v274_v25  ;;  %v178_v54 = vpop.f32.mrb[5].mxu0  ;;  %v218_v55 = vpop.f32.mrb[5].mxu1 }
  0xed   :  { %256 = vst.msk [vmem:[%s539_s3 + $0x10] sm:$0xff] %vm253_vm1, %v239_v48  ;;  %264 = vst.msk [vmem:[%s539_s3 + $0x50] sm:$0xff] %vm253_vm1, %v247_v49  ;;  %v179_v56 = vadd.f32 %v274_v25, %v178_v54  ;;  %v219_v57 = vadd.f32 %v274_v25, %v218_v55 }
  0xee   :  { %v242_v58 = vmax.f32 %v184_v52, 0.0  ;;  %v250_v59 = vmax.f32 %v224_v53, 0.0 }
  0xef   :  { %v241_v60 = vmax.f32 %v179_v56, 0.0  ;;  %v249_v61 = vmax.f32 %v219_v57, 0.0  ;;  %v336_v62 = vpop.f32.mrb[6].mxu0  ;;  %v348_v63 = vpop.f32.mrb[6].mxu1 }
  0xf0   :  { %259 = vst.msk [vmem:[%s539_s3 + $0x28] sm:$0xff] %vm253_vm1, %v242_v58  ;;  %267 = vst.msk [vmem:[%s539_s3 + $0x68] sm:$0xff] %vm253_vm1, %v250_v59  ;;  %v194_v0 = vadd.f32 %v336_v62, %v274_v25  ;;  %v234_v1 = vadd.f32 %v348_v63, %v274_v25  ;;  %v188_v2 = vpop.f32.mrb[7].mxu0  ;;  %v228_v3 = vpop.f32.mrb[7].mxu1 }
  0xf1   :  { %258 = vst.msk [vmem:[%s539_s3 + $0x20] sm:$0xff] %vm253_vm1, %v241_v60  ;;  %266 = vst.msk [vmem:[%s539_s3 + $0x60] sm:$0xff] %vm253_vm1, %v249_v61  ;;  %v189_v4 = vadd.f32 %v274_v25, %v188_v2  ;;  %v229_v5 = vadd.f32 %v274_v25, %v228_v3 }
  0xf2   :  { %v244_v6 = vmax.f32 %v194_v0, 0.0  ;;  %v252_v7 = vmax.f32 %v234_v1, 0.0 }
  0xf3   :  { %v243_v8 = vmax.f32 %v189_v4, 0.0  ;;  %v251_v9 = vmax.f32 %v229_v5, 0.0 }
  0xf4   :  { %261 = vst.msk [vmem:[%s539_s3 + $0x38] sm:$0xff] %vm253_vm1, %v244_v6  ;;  %269 = vst.msk [vmem:[%s539_s3 + $0x78] sm:$0xff] %vm253_vm1, %v252_v7 }
  0xf5   :  { %260 = vst.msk [vmem:[%s539_s3 + $0x30] sm:$0xff] %vm253_vm1, %v243_v8  ;;  %268 = vst.msk [vmem:[%s539_s3 + $0x70] sm:$0xff] %vm253_vm1, %v251_v9 }

// kernel: vae_forward.6
= control target key start
LH: loop header
LB: loop body
LE: loop exit
PB: predicated region body
PF: predicated region fallthrough
CT: control target
= control target key end

     0   :  { %vm130_vm0 = vcmask 130048   ;;  %s341_s1 = inlined_call_operand.vmem [shape: f32[128,16], index: 1, kind: input, shape index: {}]   ;;  %s342_s0 = inlined_call_operand.vmem [shape: f32[32,128], index: 0, kind: input, shape index: {}]   ;;  %s343_s2 = inlined_call_operand.vmem [shape: f32[1,16], index: 2, kind: input, shape index: {}]   ;;  %s344_s3 = inlined_call_operand.vmem [shape: f32[32,16], index: 3, kind: output, shape index: {}]  }
   0x1   :  { %v18_v0 = vld [vmem:[%s341_s1] sm:$0xff]  ;;  %v19_v1 = vld [vmem:[%s341_s1 + $0x8] sm:$0xff]  ;;  %v20_v2 = vld [vmem:[%s341_s1 + $0x10] sm:$0xff] }
   0x2   :  { %v198_v3 = vpack.c.bf16 %v19_v1, %v18_v0  ;;  %v21_v4 = vld [vmem:[%s341_s1 + $0x18] sm:$0xff]  ;;  %v22_v6 = vld [vmem:[%s341_s1 + $0x20] sm:$0xff]  ;;  %v23_v7 = vld [vmem:[%s341_s1 + $0x28] sm:$0xff] }
   0x3   :  { %v202_v5 = vpack.c.bf16 %v21_v4, %v20_v2  ;;  %v206_v8 = vpack.c.bf16 %v23_v7, %v22_v6  ;;  %v14_v9 = vld [vmem:[%s342_s0] sm:$0xff]  ;;  %v16_v10 = vld [vmem:[%s342_s0 + $0x10] sm:$0xff]  ;;  %v25_v12 = vld [vmem:[%s341_s1 + $0x38] sm:$0xff] }
   0x4   :  { %199 = vmatprep.subr.bf16.mxu0 %v198_v3  ;;  %230 = vmatprep.subr.bf16.mxu1 %v198_v3  ;;  %v24_v11 = vld [vmem:[%s341_s1 + $0x30] sm:$0xff]  ;;  %v26_v14 = vld [vmem:[%s341_s1 + $0x40] sm:$0xff]  ;;  %v27_v15 = vld [vmem:[%s341_s1 + $0x48] sm:$0xff] }
   0x5   :  { %201 = vmatpush3.bf16.msra.mxu0 %v198_v3  ;;  %238 = vmatpush3.bf16.msra.mxu1 %v198_v3  ;;  %v210_v13 = vpack.c.bf16 %v25_v12, %v24_v11  ;;  %v214_v16 = vpack.c.bf16 %v27_v15, %v26_v14  ;;  %v28_v17 = vld [vmem:[%s341_s1 + $0x50] sm:$0xff]  ;;  %v29_v18 = vld [vmem:[%s341_s1 + $0x58] sm:$0xff]  ;;  %v30_v20 = vld [vmem:[%s341_s1 + $0x60] sm:$0xff] }
   0x6   :  { %203 = vmatprep.subr.bf16.mxu0 %v202_v5  ;;  %231 = vmatprep.subr.bf16.mxu1 %v202_v5  ;;  %v218_v19 = vpack.c.bf16 %v29_v18, %v28_v17  ;;  %v31_v21 = vld [vmem:[%s341_s1 + $0x68] sm:$0xff]  ;;  %v32_v23 = vld [vmem:[%s341_s1 + $0x70] sm:$0xff]  ;;  %v33_v24 = vld [vmem:[%s341_s1 + $0x78] sm:$0xff] }
   0x7   :  { %192 = vmatprep.mubr.f32.mxu0 %v14_v9  ;;  %195 = vmatprep.mubr.f32.mxu1 %v16_v10  ;;  %v222_v22 = vpack.c.bf16 %v31_v21, %v30_v20  ;;  %v226_v25 = vpack.c.bf16 %v33_v24, %v32_v23  ;;  %v15_v26 = vld [vmem:[%s342_s0 + $0x8] sm:$0xff]  ;;  %v17_v27 = vld [vmem:[%s342_s0 + $0x18] sm:$0xff]  ;;  %v139_v28 = vld [vmem:[%s343_s2] ss:$0 sm:$0xff] }
   0x9   :  { %205 = vmatpush3.bf16.msra.mxu0 %v202_v5  ;;  %239 = vmatpush3.bf16.msra.mxu1 %v202_v5 }
   0xa   :  { %207 = vmatprep.subr.bf16.mxu0 %v206_v8  ;;  %232 = vmatprep.subr.bf16.mxu1 %v206_v8 }
   0xd   :  { %209 = vmatpush3.bf16.msra.mxu0 %v206_v8  ;;  %240 = vmatpush3.bf16.msra.mxu1 %v206_v8 }
   0xe   :  { %211 = vmatprep.subr.bf16.mxu0 %v210_v13  ;;  %233 = vmatprep.subr.bf16.mxu1 %v210_v13 }
  0x11   :  { %213 = vmatpush3.bf16.msra.mxu0 %v210_v13  ;;  %241 = vmatpush3.bf16.msra.mxu1 %v210_v13 }
  0x12   :  { %215 = vmatprep.subr.bf16.mxu0 %v214_v16  ;;  %234 = vmatprep.subr.bf16.mxu1 %v214_v16 }
  0x15   :  { %217 = vmatpush3.bf16.msra.mxu0 %v214_v16  ;;  %242 = vmatpush3.bf16.msra.mxu1 %v214_v16 }
  0x16   :  { %219 = vmatprep.subr.bf16.mxu0 %v218_v19  ;;  %235 = vmatprep.subr.bf16.mxu1 %v218_v19 }
  0x19   :  { %221 = vmatpush3.bf16.msra.mxu0 %v218_v19  ;;  %243 = vmatpush3.bf16.msra.mxu1 %v218_v19 }
  0x1a   :  { %223 = vmatprep.subr.bf16.mxu0 %v222_v22  ;;  %236 = vmatprep.subr.bf16.mxu1 %v222_v22 }
  0x1d   :  { %225 = vmatpush3.bf16.msra.mxu0 %v222_v22  ;;  %244 = vmatpush3.bf16.msra.mxu1 %v222_v22 }
  0x1e   :  { %227 = vmatprep.subr.bf16.mxu0 %v226_v25  ;;  %237 = vmatprep.subr.bf16.mxu1 %v226_v25 }
  0x21   :  { %229 = vmatpush3.bf16.msra.mxu0 %v226_v25  ;;  %245 = vmatpush3.bf16.msra.mxu1 %v226_v25 }
  0x24   :  { %193 = vmatmul.mubr.f32.vlgmr.msra.gmra.mrb[0].mxu0 %v15_v26  ;;  %196 = vmatmul.mubr.f32.vlgmr.msra.gmra.mrb[0].mxu1 %v17_v27 }
  0xf7   :  { %v194_v29 = vpop.f32.mrb[0].mxu0  ;;  %v197_v30 = vpop.f32.mrb[0].mxu1 }
  0xf8   :  { %v113_v31 = vadd.f32 %v194_v29, %v139_v28  ;;  %v123_v32 = vadd.f32 %v197_v30, %v139_v28  ;;  %v107_v33 = vpop.f32.mrb[1].mxu0  ;;  %v117_v34 = vpop.f32.mrb[1].mxu1 }
  0xf9   :  { %v108_v35 = vadd.f32 %v139_v28, %v107_v33  ;;  %v118_v36 = vadd.f32 %v139_v28, %v117_v34 }
  0xfa   :  { %v127_v37 = vmax.f32 %v113_v31, 0.0  ;;  %v129_v38 = vmax.f32 %v123_v32, 0.0 }
  0xfb   :  { %v126_v39 = vmax.f32 %v108_v35, 0.0  ;;  %v128_v40 = vmax.f32 %v118_v36, 0.0 }
  0xfc   :  { %132 = vst.msk [vmem:[%s344_s3 + $0x8] sm:$0xff] %vm130_vm0, %v127_v37  ;;  %134 = vst.msk [vmem:[%s344_s3 + $0x18] sm:$0xff] %vm130_vm0, %v129_v38 }
  0xfd   :  { %131 = vst.msk [vmem:[%s344_s3] sm:$0xff] %vm130_vm0, %v126_v39  ;;  %133 = vst.msk [vmem:[%s344_s3 + $0x10] sm:$0xff] %vm130_vm0, %v128_v40 }

// kernel: vae_forward.7
= control target key start
LH: loop header
LB: loop body
LE: loop exit
PB: predicated region body
PF: predicated region fallthrough
CT: control target
= control target key end

     0   :  { %v475_v3 = vmov 0.0|0.0   ;;  %vm476_vm0 = vmmov 0   ;;  %v477_v57 = vmov 0.0   ;;  %vm160_vm1 = vcmask 261120   ;;  %s697_s1 = inlined_call_operand.vmem [shape: f32[256,32], index: 1, kind: input, shape index: {}]   ;;  %s698_s0 = inlined_call_operand.vmem [shape: f32[2,256], index: 0, kind: input, shape index: {}]   ;;  %s699_s3 = inlined_call_operand.vmem [shape: f32[32,64], index: 3, kind: input, shape index: {}]   ;;  %s700_s5 = inlined_call_operand.vmem [shape: f32[64,256], index: 5, kind: input, shape index: {}]   ;;  %s701_s2 = inlined_call_operand.vmem [shape: f32[1,32], index: 2, kind: input, shape index: {}]   ;;  %s702_s4 = inlined_call_operand.vmem [shape: f32[1,64], index: 4, kind: input, shape index: {}]   ;;  %s703_s7 = inlined_call_operand.vmem [shape: f32[2,64], index: 7, kind: output, shape index: {0}]   ;;  %s704_s6 = inlined_call_operand.vmem [shape: f32[1,256], index: 6, kind: input, shape index: {}]   ;;  %s705_s8 = inlined_call_operand.vmem [shape: f32[2,256], index: 8, kind: output, shape index: {1}]  }
   0x1   :  { %v45_v0 = vld [vmem:[%s697_s1 + $0x80] sm:$0xff]  ;;  %v46_v1 = vld [vmem:[%s697_s1 + $0x88] sm:$0xff]  ;;  %450 = vmatprep.subr.bf16.mxu1 %v475_v3  ;;  %v47_v6 = vld [vmem:[%s697_s1 + $0x90] sm:$0xff]  ;;  %415 = vmatprep.mubr.msk.f32.mxu1 %vm476_vm0, %v477_v57  ;;  %vm234_vm2 = vcmask 517120   ;;  %vm264_vm3 = vcmask 523264  }
   0x2   :  { %v29_v2 = vld [vmem:[%s697_s1] sm:$0xff]  ;;  %v418_v4 = vpack.c.bf16 %v46_v1, %v45_v0  ;;  %v30_v5 = vld [vmem:[%s697_s1 + $0x8] sm:$0xff]  ;;  %v48_v7 = vld [vmem:[%s697_s1 + $0x98] sm:$0xff] }
   0x3   :  { %v420_v8 = vpack.c.bf16 %v30_v5, %v29_v2  ;;  %v422_v9 = vpack.c.bf16 %v48_v7, %v47_v6  ;;  %v31_v10 = vld [vmem:[%s697_s1 + $0x10] sm:$0xff]  ;;  %v32_v11 = vld [vmem:[%s697_s1 + $0x18] sm:$0xff]  ;;  %v49_v12 = vld [vmem:[%s697_s1 + $0xa0] sm:$0xff] }
   0x4   :  { %419 = vmatprep.subr.bf16.mxu0 %v418_v4  ;;  %v50_v13 = vld [vmem:[%s697_s1 + $0xa8] sm:$0xff]  ;;  %v424_v14 = vpack.c.bf16 %v32_v11, %v31_v10  ;;  %v33_v16 = vld [vmem:[%s697_s1 + $0x20] sm:$0xff]  ;;  %v51_v18 = vld [vmem:[%s697_s1 + $0xb0] sm:$0xff] }
   0x5   :  { %421 = vmatpush3.bf16.msra.mxu0 %v420_v8  ;;  %v426_v15 = vpack.c.bf16 %v50_v13, %v49_v12  ;;  %v34_v17 = vld [vmem:[%s697_s1 + $0x28] sm:$0xff]  ;;  %v52_v19 = vld [vmem:[%s697_s1 + $0xb8] sm:$0xff]  ;;  %v35_v22 = vld [vmem:[%s697_s1 + $0x30] sm:$0xff] }
   0x6   :  { %423 = vmatprep.subr.bf16.mxu0 %v422_v9  ;;  %v428_v20 = vpack.c.bf16 %v34_v17, %v33_v16  ;;  %v430_v21 = vpack.c.bf16 %v52_v19, %v51_v18  ;;  %v36_v23 = vld [vmem:[%s697_s1 + $0x38] sm:$0xff]  ;;  %v53_v24 = vld [vmem:[%s697_s1 + $0xc0] sm:$0xff]  ;;  %v54_v25 = vld [vmem:[%s697_s1 + $0xc8] sm:$0xff] }
   0x7   :  { %v362_v26 = vld.sshfl [vmem:[%s698_s0] sm:$0x33 pattern:$0x76325410]  ;;  %v150_v29 = vld [vmem:[%s699_s3 + $0x8] sm:$0xff]  ;;  %v432_v30 = vpack.c.bf16 %v36_v23, %v35_v22  ;;  %v434_v32 = vpack.c.bf16 %v54_v25, %v53_v24  ;;  %v55_v35 = vld [vmem:[%s697_s1 + $0xd0] sm:$0xff] }
   0x8   :  { %v76_v27 = vcombine.high %v362_v26, %v362_v26  ;;  %v149_v28 = vld [vmem:[%s699_s3] sm:$0xff]  ;;  %v38_v34 = vld [vmem:[%s697_s1 + $0x48] sm:$0xff]  ;;  %v56_v36 = vld [vmem:[%s697_s1 + $0xd8] sm:$0xff] }
   0x9   :  { %425 = vmatpush3.bf16.msra.mxu0 %v424_v14  ;;  %v451_v31 = vpack.c.bf16 %v150_v29, %v149_v28  ;;  %v37_v33 = vld [vmem:[%s697_s1 + $0x40] sm:$0xff]  ;;  %v438_v38 = vpack.c.bf16 %v56_v36, %v55_v35  ;;  %v39_v39 = vld [vmem:[%s697_s1 + $0x50] sm:$0xff]  ;;  %v40_v40 = vld [vmem:[%s697_s1 + $0x58] sm:$0xff] }
   0xa   :  { %427 = vmatprep.subr.bf16.mxu0 %v426_v15  ;;  %143 = vmatprep.mubr.f32.mxu0 %v76_v27  ;;  %v436_v37 = vpack.c.bf16 %v38_v34, %v37_v33  ;;  %v57_v41 = vld [vmem:[%s697_s1 + $0xe0] sm:$0xff]  ;;  %v58_v42 = vld [vmem:[%s697_s1 + $0xe8] sm:$0xff]  ;;  %v440_v43 = vpack.c.bf16 %v40_v40, %v39_v39  ;;  %v59_v47 = vld [vmem:[%s697_s1 + $0xf0] sm:$0xff]  ;;  %v254_v27 = vlaneseq }
   0xb   :  { %452 = vmatpush3.bf16.msra.mxu1 %v451_v31  ;;  %v442_v44 = vpack.c.bf16 %v58_v42, %v57_v41  ;;  %v41_v45 = vld [vmem:[%s697_s1 + $0x60] sm:$0xff]  ;;  %v42_v46 = vld [vmem:[%s697_s1 + $0x68] sm:$0xff]  ;;  %v60_v48 = vld [vmem:[%s697_s1 + $0xf8] sm:$0xff] }
   0xc   :  { %453 = vmatprep.subr.bf16.mxu1 %v475_v3  ;;  %v444_v49 = vpack.c.bf16 %v42_v46, %v41_v45  ;;  %v446_v50 = vpack.c.bf16 %v60_v48, %v59_v47  ;;  %v43_v51 = vld [vmem:[%s697_s1 + $0x70] sm:$0xff]  ;;  %v44_v52 = vld [vmem:[%s697_s1 + $0x78] sm:$0xff]  ;;  %v237_v58 = vld [vmem:[%s700_s5 + $0x8] sm:$0xff]  ;;  %v255_v28 = vshrl.u32 %v254_v27, 7 }
   0xd   :  { %429 = vmatpush3.bf16.msra.mxu0 %v428_v20  ;;  %v448_v53 = vpack.c.bf16 %v44_v52, %v43_v51  ;;  %v151_v54 = vld [vmem:[%s699_s3 + $0x10] sm:$0xff]  ;;  %v152_v55 = vld [vmem:[%s699_s3 + $0x18] sm:$0xff]  ;;  %v236_v62 = vld [vmem:[%s700_s5] sm:$0xff] }
   0xe   :  { %431 = vmatprep.subr.bf16.mxu0 %v430_v21  ;;  %v454_v56 = vpack.c.bf16 %v152_v55, %v151_v54  ;;  %v239_v59 = vld [vmem:[%s700_s5 + $0x18] sm:$0xff]  ;;  %v238_v63 = vld [vmem:[%s700_s5 + $0x10] sm:$0xff]  ;;  %v361_v0 = vld [vmem:[%s701_s2] ss:$0 sm:$0xff]  ;;  %v256_v29 = vsub.s32 0, %v255_v28  ;;  %v260_v31 = vsub.s32 1, %v255_v28 }
   0xf   :  { %v456_v60 = vpack.c.bf16 %v239_v59, %v237_v58  ;;  %v241_v2 = vld [vmem:[%s700_s5 + $0x28] sm:$0xff]  ;;  %v243_v3 = vld [vmem:[%s700_s5 + $0x38] sm:$0xff]  ;;  %v458_v5 = vpack.c.bf16 %v238_v63, %v236_v62  ;;  %v240_v8 = vld [vmem:[%s700_s5 + $0x20] sm:$0xff] }
  0x10   :  { %455 = vmatpush3.bf16.msra.mxu1 %v454_v56  ;;  %v460_v7 = vpack.c.bf16 %v243_v3, %v241_v2  ;;  %v242_v9 = vld [vmem:[%s700_s5 + $0x30] sm:$0xff]  ;;  %v245_v10 = vld [vmem:[%s700_s5 + $0x48] sm:$0xff]  ;;  %v247_v11 = vld [vmem:[%s700_s5 + $0x58] sm:$0xff] }
  0x11   :  { %433 = vmatpush3.bf16.msra.mxu0 %v432_v30  ;;  %457 = vmatprep.subr.bf16.mxu1 %v456_v60  ;;  %v462_v12 = vpack.c.bf16 %v242_v9, %v240_v8  ;;  %v464_v13 = vpack.c.bf16 %v247_v11, %v245_v10  ;;  %v244_v14 = vld [vmem:[%s700_s5 + $0x40] sm:$0xff]  ;;  %v246_v15 = vld [vmem:[%s700_s5 + $0x50] sm:$0xff]  ;;  %v249_v16 = vld [vmem:[%s700_s5 + $0x68] sm:$0xff] }
  0x12   :  { %435 = vmatprep.subr.bf16.mxu0 %v434_v32  ;;  %v251_v17 = vld [vmem:[%s700_s5 + $0x78] sm:$0xff]  ;;  %v466_v18 = vpack.c.bf16 %v246_v15, %v244_v14  ;;  %v248_v20 = vld [vmem:[%s700_s5 + $0x60] sm:$0xff]  ;;  %v250_v21 = vld [vmem:[%s700_s5 + $0x70] sm:$0xff] }
  0x13   :  { %v468_v19 = vpack.c.bf16 %v251_v17, %v249_v16  ;;  %v470_v22 = vpack.c.bf16 %v250_v21, %v248_v20  ;;  %v363_v23 = vld [vmem:[%s702_s4] ss:$0 sm:$0xff] }
  0x14   :  { %v252_v30 = vld [vmem:[%s704_s6] sm:$0x3] }
  0x15   :  { %437 = vmatpush3.bf16.msra.mxu0 %v436_v37  ;;  %v257_v32 = vrot.slane %v252_v30, %v256_v29  ;;  %v261_v33 = vrot.slane %v252_v30, %v260_v31 }
  0x16   :  { %439 = vmatprep.subr.bf16.mxu0 %v438_v38 }
  0x19   :  { %441 = vmatpush3.bf16.msra.mxu0 %v440_v43 }
  0x1a   :  { %443 = vmatprep.subr.bf16.mxu0 %v442_v44 }
  0x1d   :  { %445 = vmatpush3.bf16.msra.mxu0 %v444_v49 }
  0x1e   :  { %447 = vmatprep.subr.bf16.mxu0 %v446_v50 }
  0x21   :  { %449 = vmatpush3.bf16.msra.mxu0 %v448_v53 }
  0x24   :  { %144 = vmatmul.mubr.f32.vlgmr.msra.gmra.mrb[0].mxu0 %v362_v26 }
  0xf7   :  { %v399_v61 = vpop.f32.mrb[0].mxu0 }
  0xf8   :  { %v400_v1 = vpop.f32.mrb[1].mxu0 }
  0xf9   :  { %v401_v4 = vadd.f32 %v400_v1, %v399_v61 }
  0xfb   :  { %v146_v6 = vadd.f32 %v401_v4, %v361_v0 }
  0xfd   :  { %416 = vmatmul.mubr.msk.f32.vlgmr.msra.gmra.mrb[0].mxu1 %vm160_vm1, %v146_v6 }
  0xfe   :  { %459 = vmatpush1.bf16.msra.mxu1 %v458_v5  ;;  %332 = vmatprep.mubr.f32.mxu1 %v477_v57 }
  0xff   :  { %461 = vmatprep.subr.bf16.mxu1 %v460_v7 }
 0x102   :  { %463 = vmatpush1.bf16.msra.mxu1 %v462_v12 }
 0x103   :  { %465 = vmatprep.subr.bf16.mxu1 %v464_v13 }
 0x106   :  { %467 = vmatpush1.bf16.msra.mxu1 %v466_v18 }
 0x107   :  { %469 = vmatprep.subr.bf16.mxu1 %v468_v19 }
 0x10a   :  { %471 = vmatpush1.bf16.msra.mxu1 %v470_v22 }
 0x1d0   :  { %v230_v24 = vpop.f32.mrb[0].mxu1 }
 0x1d1   :  { %v231_v25 = vadd.f32 %v363_v23, %v230_v24  ;;  %v417_v26 = vpop.f32.mrb[1].mxu1 }
 0x1d3   :  { %235 = vst.msk [vmem:[%s703_s7] sm:$0x3] %vm234_vm2, %v231_v25  ;;  %365 = vmatmul.mubr.msk.f32.vlgmr.msra.gmra.mrb[2].mxu1 %vm264_vm3, %v231_v25 }
 0x2a6   :  { %v334_v34 = vpop.f32.mrb[2].mxu1 }
 0x2a7   :  { %v335_v35 = vadd.f32 %v334_v34, %v257_v32  ;;  %v336_v36 = vpop.f32.mrb[3].mxu1 }
 0x2a8   :  { %v337_v37 = vadd.f32 %v336_v36, %v261_v33 }
 0x2a9   :  { %v339_v38 = vmax.f32 %v335_v35, 0.0 }
 0x2aa   :  { %v340_v39 = vmax.f32 %v337_v37, 0.0 }
 0x2ac   :  { %v343_v40 = vcombine.low %v339_v38, %v340_v39 }
 0x2ae   :  { %366 = vst.sshfl [vmem:[%s705_s8] sm:$0x33 pattern:$0x76325410] %v343_v40 }

// kernel: vae_forward.8
= control target key start
LH: loop header
LB: loop body
LE: loop exit
PB: predicated region body
PF: predicated region fallthrough
CT: control target
= control target key end

     0   :  { %v209_v0 = vmov 0.0|0.0   ;;  %vm47_vm0 = vcmask 130048   ;;  %vm149_vm1 = vcmask 261120   ;;  %s345_s1 = inlined_call_operand.vmem [shape: f32[144,32], index: 1, kind: input, shape index: {}]   ;;  %s346_s0 = inlined_call_operand.vmem [shape: f32[32,144], index: 0, kind: input, shape index: {}]   ;;  %s347_s2 = inlined_call_operand.vmem [shape: f32[1,32], index: 2, kind: input, shape index: {}]   ;;  %s348_s3 = inlined_call_operand.vmem [shape: f32[32,32], index: 3, kind: output, shape index: {}]  }
   0x1   :  { %163 = vmatprep.subr.bf16.mxu0 %v209_v0  ;;  %190 = vmatprep.subr.bf16.mxu1 %v209_v0  ;;  %v22_v1 = vld [vmem:[%s345_s1] sm:$0xff]  ;;  %v23_v2 = vld [vmem:[%s345_s1 + $0x8] sm:$0xff]  ;;  %v24_v3 = vld [vmem:[%s345_s1 + $0x10] sm:$0xff] }
   0x2   :  { %v164_v4 = vpack.c.bf16 %v23_v2, %v22_v1  ;;  %v25_v5 = vld [vmem:[%s345_s1 + $0x18] sm:$0xff]  ;;  %v26_v7 = vld [vmem:[%s345_s1 + $0x20] sm:$0xff]  ;;  %v27_v8 = vld [vmem:[%s345_s1 + $0x28] sm:$0xff] }
   0x3   :  { %v167_v6 = vpack.c.bf16 %v25_v5, %v24_v3  ;;  %v15_v9 = vld [vmem:[%s346_s0 + $0x8] sm:$0xff]  ;;  %v170_v11 = vpack.c.bf16 %v27_v8, %v26_v7  ;;  %v28_v12 = vld [vmem:[%s345_s1 + $0x30] sm:$0xff]  ;;  %v29_v13 = vld [vmem:[%s345_s1 + $0x38] sm:$0xff] }
   0x4   :  { %165 = vmatpush1.bf16.msra.mxu0 %v164_v4  ;;  %199 = vmatpush1.bf16.msra.mxu1 %v164_v4  ;;  %v19_v10 = vld [vmem:[%s346_s0 + $0x28] sm:$0xff]  ;;  %v173_v14 = vpack.c.bf16 %v29_v13, %v28_v12  ;;  %v30_v15 = vld [vmem:[%s345_s1 + $0x40] sm:$0xff]  ;;  %v32_v18 = vld [vmem:[%s345_s1 + $0x50] sm:$0xff] }
   0x5   :  { %166 = vmatprep.subr.bf16.mxu0 %v209_v0  ;;  %191 = vmatprep.subr.bf16.mxu1 %v209_v0  ;;  %v31_v16 = vld [vmem:[%s345_s1 + $0x48] sm:$0xff]  ;;  %v33_v19 = vld [vmem:[%s345_s1 + $0x58] sm:$0xff]  ;;  %v34_v21 = vld [vmem:[%s345_s1 + $0x60] sm:$0xff] }
   0x6   :  { %159 = vmatprep.mubr.msk.f32.mxu0 %vm47_vm0, %v15_v9  ;;  %161 = vmatprep.mubr.msk.f32.mxu1 %vm47_vm0, %v19_v10  ;;  %v176_v17 = vpack.c.bf16 %v31_v16, %v30_v15  ;;  %v179_v20 = vpack.c.bf16 %v33_v19, %v32_v18  ;;  %v35_v22 = vld [vmem:[%s345_s1 + $0x68] sm:$0xff]  ;;  %v36_v24 = vld [vmem:[%s345_s1 + $0x70] sm:$0xff]  ;;  %v37_v25 = vld [vmem:[%s345_s1 + $0x78] sm:$0xff] }
   0x7   :  { %v182_v23 = vpack.c.bf16 %v35_v22, %v34_v21  ;;  %v185_v26 = vpack.c.bf16 %v37_v25, %v36_v24  ;;  %v38_v27 = vld [vmem:[%s345_s1 + $0x80] sm:$0xff]  ;;  %v39_v28 = vld [vmem:[%s345_s1 + $0x88] sm:$0xff]  ;;  %v17_v32 = vld [vmem:[%s346_s0 + $0x18] sm:$0xff] }
   0x8   :  { %168 = vmatpush1.bf16.msra.mxu0 %v167_v6  ;;  %200 = vmatpush1.bf16.msra.mxu1 %v167_v6  ;;  %v188_v29 = vpack.c.bf16 %v39_v28, %v38_v27  ;;  %v14_v30 = vld [vmem:[%s346_s0] sm:$0xff]  ;;  %v21_v33 = vld [vmem:[%s346_s0 + $0x38] sm:$0xff]  ;;  %v16_v34 = vld [vmem:[%s346_s0 + $0x10] sm:$0xff] }
   0x9   :  { %169 = vmatprep.subr.bf16.mxu0 %v209_v0  ;;  %192 = vmatprep.subr.bf16.mxu1 %v209_v0  ;;  %v18_v31 = vld [vmem:[%s346_s0 + $0x20] sm:$0xff]  ;;  %v20_v35 = vld [vmem:[%s346_s0 + $0x30] sm:$0xff] }
   0xa   :  { %v158_v36 = vld [vmem:[%s347_s2] ss:$0 sm:$0xff] }
   0xc   :  { %171 = vmatpush1.bf16.msra.mxu0 %v170_v11  ;;  %201 = vmatpush1.bf16.msra.mxu1 %v170_v11 }
   0xd   :  { %172 = vmatprep.subr.bf16.mxu0 %v209_v0  ;;  %193 = vmatprep.subr.bf16.mxu1 %v209_v0 }
  0x10   :  { %174 = vmatpush1.bf16.msra.mxu0 %v173_v14  ;;  %202 = vmatpush1.bf16.msra.mxu1 %v173_v14 }
  0x11   :  { %175 = vmatprep.subr.bf16.mxu0 %v209_v0  ;;  %194 = vmatprep.subr.bf16.mxu1 %v209_v0 }
  0x14   :  { %177 = vmatpush1.bf16.msra.mxu0 %v176_v17  ;;  %203 = vmatpush1.bf16.msra.mxu1 %v176_v17 }
  0x15   :  { %178 = vmatprep.subr.bf16.mxu0 %v209_v0  ;;  %195 = vmatprep.subr.bf16.mxu1 %v209_v0 }
  0x18   :  { %180 = vmatpush1.bf16.msra.mxu0 %v179_v20  ;;  %204 = vmatpush1.bf16.msra.mxu1 %v179_v20 }
  0x19   :  { %181 = vmatprep.subr.bf16.mxu0 %v209_v0  ;;  %196 = vmatprep.subr.bf16.mxu1 %v209_v0 }
  0x1c   :  { %183 = vmatpush1.bf16.msra.mxu0 %v182_v23  ;;  %205 = vmatpush1.bf16.msra.mxu1 %v182_v23 }
  0x1d   :  { %184 = vmatprep.subr.bf16.mxu0 %v209_v0  ;;  %197 = vmatprep.subr.bf16.mxu1 %v209_v0 }
  0x20   :  { %186 = vmatpush1.bf16.msra.mxu0 %v185_v26  ;;  %206 = vmatpush1.bf16.msra.mxu1 %v185_v26 }
  0x21   :  { %187 = vmatprep.subr.bf16.mxu0 %v209_v0  ;;  %198 = vmatprep.subr.bf16.mxu1 %v209_v0 }
  0x24   :  { %189 = vmatpush1.bf16.msra.mxu0 %v188_v29  ;;  %207 = vmatpush1.bf16.msra.mxu1 %v188_v29 }
  0x27   :  { %125 = vmatmul.mubr.f32.vlgmr.msra.gmra.mrb[0].mxu0 %v14_v30  ;;  %135 = vmatmul.mubr.f32.vlgmr.msra.gmra.mrb[0].mxu1 %v18_v31 }
  0x28   :  { %160 = vmatprep.mubr.msk.f32.mxu0 %vm47_vm0, %v17_v32  ;;  %162 = vmatprep.mubr.msk.f32.mxu1 %vm47_vm0, %v21_v33 }
  0x2b   :  { %130 = vmatmul.mubr.f32.gmra.mrb[2].mxu0 %v16_v34  ;;  %140 = vmatmul.mubr.f32.gmra.mrb[2].mxu1 %v20_v35 }
  0xfa   :  { %v126_v37 = vpop.f32.mrb[0].mxu0  ;;  %v136_v38 = vpop.f32.mrb[0].mxu1 }
  0xfb   :  { %v127_v39 = vadd.f32 %v158_v36, %v126_v37  ;;  %v137_v40 = vadd.f32 %v158_v36, %v136_v38  ;;  %v128_v41 = vpop.f32.mrb[1].mxu0  ;;  %v138_v42 = vpop.f32.mrb[1].mxu1 }
  0xfd   :  { %v145_v43 = vmax.f32 %v127_v39, 0.0  ;;  %v147_v44 = vmax.f32 %v137_v40, 0.0 }
  0xfe   :  { %v131_v45 = vpop.f32.mrb[2].mxu0  ;;  %v141_v46 = vpop.f32.mrb[2].mxu1 }
  0xff   :  { %150 = vst.msk [vmem:[%s348_s3] sm:$0xff] %vm149_vm1, %v145_v43  ;;  %152 = vst.msk [vmem:[%s348_s3 + $0x10] sm:$0xff] %vm149_vm1, %v147_v44  ;;  %v132_v47 = vadd.f32 %v158_v36, %v131_v45  ;;  %v142_v48 = vadd.f32 %v158_v36, %v141_v46  ;;  %v133_v49 = vpop.f32.mrb[3].mxu0  ;;  %v143_v50 = vpop.f32.mrb[3].mxu1 }
 0x101   :  { %v146_v51 = vmax.f32 %v132_v47, 0.0  ;;  %v148_v52 = vmax.f32 %v142_v48, 0.0 }
 0x103   :  { %151 = vst.msk [vmem:[%s348_s3 + $0x8] sm:$0xff] %vm149_vm1, %v146_v51  ;;  %153 = vst.msk [vmem:[%s348_s3 + $0x18] sm:$0xff] %vm149_vm1, %v148_v52 }

// kernel: vae_forward.9
= control target key start
LH: loop header
LB: loop body
LE: loop exit
PB: predicated region body
PF: predicated region fallthrough
CT: control target
= control target key end

     0   :  { %vm46_vm0 = vcmask 588800   ;;  %vm336_vm1 = vcmask 97280   ;;  %s743_s1 = inlined_call_operand.vmem [shape: f32[72,12], index: 1, kind: input, shape index: {}]   ;;  %s744_s0 = inlined_call_operand.vmem [shape: f32[128,72], index: 0, kind: input, shape index: {}]   ;;  %s745_s2 = inlined_call_operand.vmem [shape: f32[1,12], index: 2, kind: input, shape index: {}]   ;;  %s746_s3 = inlined_call_operand.vmem [shape: f32[128,12], index: 3, kind: output, shape index: {}]  }
   0x1   :  { %v30_v0 = vld [vmem:[%s743_s1] sm:$0xff]  ;;  %v31_v1 = vld [vmem:[%s743_s1 + $0x8] sm:$0xff]  ;;  %v32_v2 = vld [vmem:[%s743_s1 + $0x10] sm:$0xff] }
   0x2   :  { %v457_v3 = vpack.c.bf16 %v31_v1, %v30_v0  ;;  %v33_v4 = vld [vmem:[%s743_s1 + $0x18] sm:$0xff]  ;;  %v34_v6 = vld [vmem:[%s743_s1 + $0x20] sm:$0xff]  ;;  %v35_v7 = vld [vmem:[%s743_s1 + $0x28] sm:$0xff] }
   0x3   :  { %v461_v5 = vpack.c.bf16 %v33_v4, %v32_v2  ;;  %v14_v8 = vld [vmem:[%s744_s0] sm:$0xff]  ;;  %v465_v10 = vpack.c.bf16 %v35_v7, %v34_v6  ;;  %v36_v11 = vld [vmem:[%s743_s1 + $0x30] sm:$0xff]  ;;  %v37_v12 = vld [vmem:[%s743_s1 + $0x38] sm:$0xff] }
   0x4   :  { %458 = vmatprep.subr.bf16.mxu0 %v457_v3  ;;  %473 = vmatprep.subr.bf16.mxu1 %v457_v3  ;;  %v22_v9 = vld [vmem:[%s744_s0 + $0x40] sm:$0xff]  ;;  %v469_v13 = vpack.c.bf16 %v37_v12, %v36_v11  ;;  %v15_v15 = vld [vmem:[%s744_s0 + $0x8] sm:$0xff]  ;;  %v16_v17 = vld [vmem:[%s744_s0 + $0x10] sm:$0xff] }
   0x5   :  { %460 = vmatpush3.bf16.msra.mxu0 %v457_v3  ;;  %478 = vmatpush3.bf16.msra.mxu1 %v457_v3  ;;  %v38_v14 = vld [vmem:[%s743_s1 + $0x40] sm:$0xff]  ;;  %v23_v16 = vld [vmem:[%s744_s0 + $0x48] sm:$0xff]  ;;  %v24_v18 = vld [vmem:[%s744_s0 + $0x50] sm:$0xff] }
   0x6   :  { %462 = vmatprep.subr.bf16.mxu0 %v461_v5  ;;  %474 = vmatprep.subr.bf16.mxu1 %v461_v5  ;;  %v17_v19 = vld [vmem:[%s744_s0 + $0x18] sm:$0xff]  ;;  %v18_v21 = vld [vmem:[%s744_s0 + $0x20] sm:$0xff]  ;;  %v19_v23 = vld [vmem:[%s744_s0 + $0x28] sm:$0xff] }
   0x7   :  { %433 = vmatprep.mubr.msk.f32.mxu0 %vm46_vm0, %v14_v8  ;;  %445 = vmatprep.mubr.msk.f32.mxu1 %vm46_vm0, %v22_v9  ;;  %v25_v20 = vld [vmem:[%s744_s0 + $0x58] sm:$0xff]  ;;  %v26_v22 = vld [vmem:[%s744_s0 + $0x60] sm:$0xff]  ;;  %v27_v24 = vld [vmem:[%s744_s0 + $0x68] sm:$0xff] }
   0x8   :  { %v20_v25 = vld [vmem:[%s744_s0 + $0x30] sm:$0xff]  ;;  %v21_v27 = vld [vmem:[%s744_s0 + $0x38] sm:$0xff]  ;;  %v661_v29 = vld [vmem:[%s745_s2] ss:$0 sm:$0xff] }
   0x9   :  { %464 = vmatpush3.bf16.msra.mxu0 %v461_v5  ;;  %479 = vmatpush3.bf16.msra.mxu1 %v461_v5  ;;  %v28_v26 = vld [vmem:[%s744_s0 + $0x70] sm:$0xff]  ;;  %v29_v28 = vld [vmem:[%s744_s0 + $0x78] sm:$0xff] }
   0xa   :  { %466 = vmatprep.subr.bf16.mxu0 %v465_v10  ;;  %475 = vmatprep.subr.bf16.mxu1 %v465_v10 }
   0xd   :  { %468 = vmatpush3.bf16.msra.mxu0 %v465_v10  ;;  %480 = vmatpush3.bf16.msra.mxu1 %v465_v10 }
   0xe   :  { %470 = vmatprep.subr.bf16.mxu0 %v469_v13  ;;  %476 = vmatprep.subr.bf16.mxu1 %v469_v13 }
  0x11   :  { %472 = vmatpush3.bf16.msra.mxu0 %v469_v13  ;;  %481 = vmatpush3.bf16.msra.mxu1 %v469_v13 }
  0x12   :  { %431 = vmatprep.subr.mxu0 %v38_v14  ;;  %477 = vmatprep.subr.mxu1 %v38_v14 }
  0x15   :  { %432 = vmatpush3.msra.mxu0 %v38_v14  ;;  %482 = vmatpush3.msra.mxu1 %v38_v14 }
  0x16   :  { %434 = vmatmul.mubr.msk.f32.vlgmr.msra.gmra.mrb[0].mxu0 %vm46_vm0, %v15_v15  ;;  %446 = vmatmul.mubr.msk.f32.vlgmr.msra.gmra.mrb[0].mxu1 %vm46_vm0, %v23_v16 }
  0x17   :  { %436 = vmatprep.mubr.msk.f32.mxu0 %vm46_vm0, %v16_v17  ;;  %448 = vmatprep.mubr.msk.f32.mxu1 %vm46_vm0, %v24_v18 }
  0x1a   :  { %437 = vmatmul.mubr.msk.f32.gmra.mrb[2].mxu0 %vm46_vm0, %v17_v19  ;;  %449 = vmatmul.mubr.msk.f32.gmra.mrb[2].mxu1 %vm46_vm0, %v25_v20 }
  0x1b   :  { %439 = vmatprep.mubr.msk.f32.mxu0 %vm46_vm0, %v18_v21  ;;  %451 = vmatprep.mubr.msk.f32.mxu1 %vm46_vm0, %v26_v22 }
  0x1e   :  { %440 = vmatmul.mubr.msk.f32.gmra.mrb[4].mxu0 %vm46_vm0, %v19_v23  ;;  %452 = vmatmul.mubr.msk.f32.gmra.mrb[4].mxu1 %vm46_vm0, %v27_v24 }
  0x1f   :  { %442 = vmatprep.mubr.msk.f32.mxu0 %vm46_vm0, %v20_v25  ;;  %454 = vmatprep.mubr.msk.f32.mxu1 %vm46_vm0, %v28_v26 }
  0x22   :  { %443 = vmatmul.mubr.msk.f32.gmra.mrb[6].mxu0 %vm46_vm0, %v21_v27  ;;  %455 = vmatmul.mubr.msk.f32.gmra.mrb[6].mxu1 %vm46_vm0, %v29_v28 }
  0xe9   :  { %v435_v30 = vpop.f32.mrb[0].mxu0  ;;  %v447_v31 = vpop.f32.mrb[0].mxu1 }
  0xea   :  { %v167_v32 = vadd.f32 %v435_v30, %v661_v29  ;;  %v207_v33 = vadd.f32 %v447_v31, %v661_v29  ;;  %v161_v34 = vpop.f32.mrb[1].mxu0  ;;  %v201_v35 = vpop.f32.mrb[1].mxu1 }
  0xeb   :  { %v162_v36 = vadd.f32 %v661_v29, %v161_v34  ;;  %v202_v37 = vadd.f32 %v661_v29, %v201_v35 }
  0xec   :  { %v375_v38 = vmul.f32 -1.442695, %v167_v32  ;;  %v383_v39 = vmul.f32 -1.442695, %v207_v33 }
  0xed   :  { %v374_v40 = vmul.f32 -1.442695, %v162_v36  ;;  %v382_v41 = vmul.f32 -1.442695, %v202_v37  ;;  %v438_v42 = vpop.f32.mrb[2].mxu0  ;;  %v450_v43 = vpop.f32.mrb[2].mxu1 }
  0xee   :  { %483 = vpow2.f32 %v375_v38  ;;  %v177_v44 = vadd.f32 %v438_v42, %v661_v29  ;;  %v217_v45 = vadd.f32 %v450_v43, %v661_v29  ;;  %v171_v46 = vpop.f32.mrb[3].mxu0  ;;  %v211_v47 = vpop.f32.mrb[3].mxu1 }
  0xef   :  { %485 = vpow2.f32 %v383_v39  ;;  %v172_v48 = vadd.f32 %v661_v29, %v171_v46  ;;  %v212_v49 = vadd.f32 %v661_v29, %v211_v47 }
  0xf0   :  { %487 = vpow2.f32 %v374_v40  ;;  %v377_v50 = vmul.f32 -1.442695, %v177_v44  ;;  %v385_v51 = vmul.f32 -1.442695, %v217_v45 }
  0xf1   :  { %489 = vpow2.f32 %v382_v41  ;;  %v376_v52 = vmul.f32 -1.442695, %v172_v48  ;;  %v384_v53 = vmul.f32 -1.442695, %v212_v49  ;;  %v441_v54 = vpop.f32.mrb[4].mxu0  ;;  %v453_v55 = vpop.f32.mrb[4].mxu1 }
  0xf2   :  { %491 = vpow2.f32 %v377_v50  ;;  %v187_v56 = vadd.f32 %v441_v54, %v661_v29  ;;  %v227_v57 = vadd.f32 %v453_v55, %v661_v29  ;;  %v181_v58 = vpop.f32.mrb[5].mxu0  ;;  %v221_v59 = vpop.f32.mrb[5].mxu1 }
  0xf3   :  { %493 = vpow2.f32 %v385_v51  ;;  %v182_v60 = vadd.f32 %v661_v29, %v181_v58  ;;  %v222_v61 = vadd.f32 %v661_v29, %v221_v59 }
  0xf4   :  { %495 = vpow2.f32 %v376_v52  ;;  %v379_v62 = vmul.f32 -1.442695, %v187_v56  ;;  %v387_v63 = vmul.f32 -1.442695, %v227_v57 }
  0xf5   :  { %497 = vpow2.f32 %v384_v53  ;;  %v378_v0 = vmul.f32 -1.442695, %v182_v60  ;;  %v386_v1 = vmul.f32 -1.442695, %v222_v61  ;;  %v444_v2 = vpop.f32.mrb[6].mxu0  ;;  %v456_v3 = vpop.f32.mrb[6].mxu1 }
  0xf6   :  { %499 = vpow2.f32 %v379_v62  ;;  %v197_v4 = vadd.f32 %v444_v2, %v661_v29  ;;  %v191_v5 = vpop.f32.mrb[7].mxu0  ;;  %v231_v6 = vpop.f32.mrb[7].mxu1  ;;  %v237_v25 = vadd.f32 %v456_v3, %v661_v29 }
  0xf7   :  { %501 = vpow2.f32 %v387_v63  ;;  %v192_v28 = vadd.f32 %v661_v29, %v191_v5  ;;  %v232_v32 = vadd.f32 %v661_v29, %v231_v6 }
  0xf8   :  { %v484_v7 = vpop.eup %483  ;;  %503 = vpow2.f32 %v378_v0  ;;  %v381_v8 = vmul.f32 -1.442695, %v197_v4  ;;  %v389_v37 = vmul.f32 -1.442695, %v237_v25 }
  0xf9   :  { %v486_v9 = vpop.eup %485  ;;  %v289_v10 = vadd.f32 1.0, %v484_v7  ;;  %505 = vpow2.f32 %v386_v1  ;;  %v380_v40 = vmul.f32 -1.442695, %v192_v28  ;;  %v388_v29 = vmul.f32 -1.442695, %v232_v32 }
  0xfa   :  { %v488_v11 = vpop.eup %487  ;;  %v297_v12 = vadd.f32 1.0, %v486_v9  ;;  %507 = vpow2.f32 %v381_v8 }
  0xfb   :  { %v490_v13 = vpop.eup %489  ;;  %509 = vrcp.f32 %v289_v10  ;;  %v288_v14 = vadd.f32 1.0, %v488_v11 }
  0xfc   :  { %v492_v15 = vpop.eup %491  ;;  %511 = vrcp.f32 %v297_v12  ;;  %v296_v16 = vadd.f32 1.0, %v490_v13 }
  0xfd   :  { %v494_v17 = vpop.eup %493  ;;  %513 = vrcp.f32 %v288_v14  ;;  %v291_v18 = vadd.f32 1.0, %v492_v15 }
  0xfe   :  { %v496_v19 = vpop.eup %495  ;;  %515 = vrcp.f32 %v296_v16  ;;  %v299_v20 = vadd.f32 1.0, %v494_v17 }
  0xff   :  { %v498_v21 = vpop.eup %497  ;;  %517 = vrcp.f32 %v291_v18  ;;  %v290_v22 = vadd.f32 1.0, %v496_v19 }
 0x100   :  { %v500_v23 = vpop.eup %499  ;;  %519 = vrcp.f32 %v299_v20  ;;  %v298_v24 = vadd.f32 1.0, %v498_v21 }
 0x101   :  { %v502_v26 = vpop.eup %501  ;;  %521 = vrcp.f32 %v290_v22  ;;  %v293_v27 = vadd.f32 1.0, %v500_v23 }
 0x102   :  { %v504_v30 = vpop.eup %503  ;;  %523 = vrcp.f32 %v298_v24  ;;  %v301_v31 = vadd.f32 1.0, %v502_v26 }
 0x103   :  { %v506_v33 = vpop.eup %505  ;;  %525 = vrcp.f32 %v293_v27  ;;  %v292_v34 = vadd.f32 1.0, %v504_v30 }
 0x104   :  { %v508_v35 = vpop.eup %507  ;;  %527 = vrcp.f32 %v301_v31  ;;  %v300_v36 = vadd.f32 1.0, %v506_v33 }
 0x105   :  { %v510_v38 = vpop.eup %509  ;;  %529 = vrcp.f32 %v292_v34  ;;  %v295_v39 = vadd.f32 1.0, %v508_v35 }
 0x106   :  { %v512_v41 = vpop.eup %511  ;;  %338 = vst.msk [vmem:[%s746_s3 + $0x8] sm:$0xff] %vm336_vm1, %v510_v38  ;;  %531 = vrcp.f32 %v300_v36 }
 0x107   :  { %v514_v42 = vpop.eup %513  ;;  %346 = vst.msk [vmem:[%s746_s3 + $0x48] sm:$0xff] %vm336_vm1, %v512_v41  ;;  %533 = vrcp.f32 %v295_v39 }
 0x108   :  { %v516_v43 = vpop.eup %515  ;;  %337 = vst.msk [vmem:[%s746_s3] sm:$0xff] %vm336_vm1, %v514_v42  ;;  %535 = vpow2.f32 %v389_v37 }
 0x109   :  { %v518_v44 = vpop.eup %517  ;;  %345 = vst.msk [vmem:[%s746_s3 + $0x40] sm:$0xff] %vm336_vm1, %v516_v43  ;;  %537 = vpow2.f32 %v380_v40 }
 0x10a   :  { %v520_v45 = vpop.eup %519  ;;  %340 = vst.msk [vmem:[%s746_s3 + $0x18] sm:$0xff] %vm336_vm1, %v518_v44  ;;  %539 = vpow2.f32 %v388_v29 }
 0x10b   :  { %v522_v46 = vpop.eup %521  ;;  %348 = vst.msk [vmem:[%s746_s3 + $0x58] sm:$0xff] %vm336_vm1, %v520_v45 }
 0x10c   :  { %v524_v47 = vpop.eup %523  ;;  %339 = vst.msk [vmem:[%s746_s3 + $0x10] sm:$0xff] %vm336_vm1, %v522_v46 }
 0x10d   :  { %v526_v48 = vpop.eup %525  ;;  %347 = vst.msk [vmem:[%s746_s3 + $0x50] sm:$0xff] %vm336_vm1, %v524_v47 }
 0x10e   :  { %v528_v49 = vpop.eup %527  ;;  %342 = vst.msk [vmem:[%s746_s3 + $0x28] sm:$0xff] %vm336_vm1, %v526_v48 }
 0x10f   :  { %v530_v50 = vpop.eup %529  ;;  %350 = vst.msk [vmem:[%s746_s3 + $0x68] sm:$0xff] %vm336_vm1, %v528_v49 }
 0x110   :  { %v532_v51 = vpop.eup %531  ;;  %341 = vst.msk [vmem:[%s746_s3 + $0x20] sm:$0xff] %vm336_vm1, %v530_v50 }
 0x111   :  { %v534_v52 = vpop.eup %533  ;;  %349 = vst.msk [vmem:[%s746_s3 + $0x60] sm:$0xff] %vm336_vm1, %v532_v51 }
 0x112   :  { %v536_v53 = vpop.eup %535  ;;  %344 = vst.msk [vmem:[%s746_s3 + $0x38] sm:$0xff] %vm336_vm1, %v534_v52 }
 0x113   :  { %v538_v54 = vpop.eup %537  ;;  %v303_v55 = vadd.f32 1.0, %v536_v53 }
 0x114   :  { %v540_v56 = vpop.eup %539  ;;  %v294_v57 = vadd.f32 1.0, %v538_v54 }
 0x115   :  { %541 = vrcp.f32 %v303_v55  ;;  %v302_v58 = vadd.f32 1.0, %v540_v56 }
 0x116   :  { %543 = vrcp.f32 %v294_v57 }
 0x117   :  { %545 = vrcp.f32 %v302_v58 }
 0x11f   :  { %v542_v59 = vpop.eup %541 }
 0x120   :  { %v544_v60 = vpop.eup %543  ;;  %352 = vst.msk [vmem:[%s746_s3 + $0x78] sm:$0xff] %vm336_vm1, %v542_v59 }
 0x121   :  { %v546_v61 = vpop.eup %545  ;;  %343 = vst.msk [vmem:[%s746_s3 + $0x30] sm:$0xff] %vm336_vm1, %v544_v60 }
 0x122   :  { %351 = vst.msk [vmem:[%s746_s3 + $0x70] sm:$0xff] %vm336_vm1, %v546_v61 }

</bundles_post_ra>
